<compile_context>
chip_gen: v7x
topology: tpu7x:2x2x1
jax: 0.10.0
libtpu: 0.0.40
codegen_flags: <defaults>
</compile_context>

<pallas_src>
import functools

import jax
import jax.numpy as jnp
from jax.experimental import pallas as pl
from jax.experimental.pallas import tpu as pltpu


# ---------------------------------------------------------------------------
# Fused matmul (+ bias + activation + BN affine + post-activation) kernels
# ---------------------------------------------------------------------------

_VMEM_LIMIT_BYTES = 48 * 1024 * 1024        # fits v7x's 64 MiB VMEM w/ headroom
_RESIDENT_BUDGET_BYTES = 40 * 1024 * 1024   # double-buffered operand budget


def _apply_activation(y, name):
    if name == "relu":
        return jnp.maximum(y, 0.0)
    if name == "tanh":
        return jnp.tanh(y)
    if name == "sigmoid":
        return jax.nn.sigmoid(y)
    return y


def _epilogue(y, e_ref, activation, post_activation):
    # e_ref rows: 0 = bias, 1 = folded BN scale, 2 = folded BN shift.
    y = y + e_ref[0:1, :]
    y = _apply_activation(y, activation)
    y = y * e_ref[1:2, :] + e_ref[2:3, :]
    return _apply_activation(y, post_activation)


def _mm_kernel_resident(x_ref, w_ref, e_ref, o_ref, *, activation, post_activation):
    """Whole weight resident in VMEM: single dot + fused epilogue, no scratch."""
    y = jnp.dot(x_ref[...], w_ref[...], preferred_element_type=jnp.float32)
    o_ref[...] = _epilogue(y, e_ref, activation, post_activation).astype(o_ref.dtype)


def _mm_kernel_ksplit(x_ref, w_ref, e_ref, o_ref, acc_ref, *, activation,
                      post_activation):
    """Fallback for weights too large to keep resident: K-tiled accumulation."""
    k = pl.program_id(2)

    @pl.when(k == 0)
    def _init():
        acc_ref[...] = jnp.zeros_like(acc_ref)

    acc_ref[...] += jnp.dot(x_ref[...], w_ref[...],
                            preferred_element_type=jnp.float32)

    @pl.when(k == pl.num_programs(2) - 1)
    def _finalize():
        o_ref[...] = _epilogue(acc_ref[...], e_ref, activation,
                               post_activation).astype(o_ref.dtype)


def _round_up(x, m):
    return ((x + m - 1) // m) * m


def _pad2d(a, rows, cols):
    return jnp.pad(a, ((0, rows - a.shape[0]), (0, cols - a.shape[1])))


def fused_matmul(x, w, bias=None, bn_scale=None, bn_shift=None,
                 activation="none", post_activation="none",
                 out_dtype=jnp.float32):
    """out = post_act(bn_scale * act(x @ w + bias) + bn_shift).

    x: (M, K) f32 activations (cast to w.dtype for the MXU); w: (K, N) packed
    weight already in the desired operand dtype (bf16 or f32); accumulation and
    epilogue run in f32.
    """
    M, K = x.shape
    K2, N = w.shape
    assert K == K2
    f32 = jnp.float32
    operand_dtype = w.dtype
    bias = jnp.zeros((N,), f32) if bias is None else bias.astype(f32)
    scale = jnp.ones((N,), f32) if bn_scale is None else bn_scale.astype(f32)
    shift = jnp.zeros((N,), f32) if bn_shift is None else bn_shift.astype(f32)

    # Tiny row counts (per-utterance ops): a padded Pallas launch wastes >90%
    # of the MXU work — keep them in plain JAX.
    if M < 16:
        y = jnp.dot(x.astype(f32), w.astype(f32), preferred_element_type=f32)
        y = _apply_activation(y + bias, activation)
        y = _apply_activation(y * scale + shift, post_activation)
        return y.astype(out_dtype)

    item = jnp.dtype(operand_dtype).itemsize
    TM = 512 if M > 512 else _round_up(M, 8)
    Kp0, Np0 = _round_up(K, 128), _round_up(N, 128)

    # Prefer a VMEM-resident weight (K/N grid axes collapse; x streams over M).
    resident_bytes = 2 * (TM * Kp0 * item + Kp0 * Np0 * item
                          + TM * Np0 * 4 + 8 * Np0 * 4)
    if resident_bytes <= _RESIDENT_BUDGET_BYTES:
        TK, TN = Kp0, Np0
    else:
        TK, TN = min(Kp0, 512), min(Np0, 512)
    Mp, Kp, Np = _round_up(M, TM), _round_up(K, TK), _round_up(N, TN)

    xp = _pad2d(x.astype(operand_dtype), Mp, Kp)
    wp = _pad2d(w.astype(operand_dtype), Kp, Np)
    # One packed, sublane-aligned epilogue operand (rows 0..2 used).
    epi = jnp.zeros((8, Np), f32)
    epi = epi.at[0, :N].set(bias).at[1, :N].set(scale).at[2, :N].set(shift)

    if Kp // TK == 1:
        grid = (Mp // TM, Np // TN)    # M axis "parallel" -> shards across TCs
        kernel = functools.partial(_mm_kernel_resident, activation=activation,
                                   post_activation=post_activation)
        in_specs = [
            pl.BlockSpec((TM, TK), lambda i, j: (i, 0)),
            pl.BlockSpec((TK, TN), lambda i, j: (0, j)),
            pl.BlockSpec((8, TN), lambda i, j: (0, j)),
        ]
        out_spec = pl.BlockSpec((TM, TN), lambda i, j: (i, j))
        scratch = []
        semantics = ("parallel", "parallel")
    else:
        grid = (Mp // TM, Np // TN, Kp // TK)
        kernel = functools.partial(_mm_kernel_ksplit, activation=activation,
                                   post_activation=post_activation)
        in_specs = [
            pl.BlockSpec((TM, TK), lambda i, j, k: (i, k)),
            pl.BlockSpec((TK, TN), lambda i, j, k: (k, j)),
            pl.BlockSpec((8, TN), lambda i, j, k: (0, j)),
        ]
        out_spec = pl.BlockSpec((TM, TN), lambda i, j, k: (i, j))
        scratch = [pltpu.VMEM((TM, TN), jnp.float32)]
        semantics = ("parallel", "parallel", "arbitrary")

    out = pl.pallas_call(
        kernel,
        out_shape=jax.ShapeDtypeStruct((Mp, Np), out_dtype),
        grid=grid,
        in_specs=in_specs,
        out_specs=out_spec,
        scratch_shapes=scratch,
        compiler_params=pltpu.CompilerParams(
            dimension_semantics=semantics,
            vmem_limit_bytes=_VMEM_LIMIT_BYTES),
    )(xp, wp, epi)

    if Mp == M and Np == N:
        return out
    return out[:M, :N]


# ---------------------------------------------------------------------------
# Channels-last (B, T, C) model blocks built on the fused matmul
# ---------------------------------------------------------------------------

def bn_affine(gamma, beta, mean, var, eps=1e-5):
    scale = gamma / jnp.sqrt(var + eps)
    shift = beta - mean * scale
    return scale, shift


def conv1d_cl(x, w2d, b, kernel, dilation, activation="none",
              scale=None, shift=None, post_activation="none"):
    """x: (B, T, Cin) channels-last; w2d: (Cin*kernel, Cout), tap-major packed.

    SpeechBrain "same" reflect padding; returns (B, T, Cout).
    """
    B, T, _ = x.shape
    if kernel > 1:
        pad = dilation * (kernel - 1) // 2
        xp = jnp.pad(x, ((0, 0), (pad, pad), (0, 0)), mode="reflect")
        # im2col as k shifted slices concatenated on the lane-dense channel axis
        # (no (B,C,T)<->(B,T,C) relayouts, no stacked-then-transposed patches).
        x = jnp.concatenate([xp[:, j * dilation: j * dilation + T, :]
                             for j in range(kernel)], axis=-1)
    Cout = w2d.shape[1]
    y2d = fused_matmul(x.reshape(B * T, x.shape[-1]), w2d, b, scale, shift,
                       activation, post_activation)
    return y2d.reshape(B, T, Cout)


def tdnn_block_cl(x, p, kernel, dilation, post_activation="none"):
    """TDNNBlock = BatchNorm(ReLU(Conv1d(x))) with BN folded into the epilogue."""
    return conv1d_cl(x, p["w2d"], p["b"], kernel, dilation, activation="relu",
                     scale=p["scale"], shift=p["shift"],
                     post_activation=post_activation)


def res2net_block_cl(x, plist, scale, kernel, dilation):
    chunks = jnp.split(x, scale, axis=-1)
    outs = [chunks[0]]
    y_i = None
    for i in range(1, scale):
        inp = chunks[i] if i == 1 else chunks[i] + y_i
        y_i = tdnn_block_cl(inp, plist[i - 1], kernel, dilation)
        outs.append(y_i)
    return jnp.concatenate(outs, axis=-1)


def se_block_cl(x, p):
    """Squeeze-and-excitation; M = batch rows -> plain JAX, not Pallas."""
    s = jnp.mean(x, axis=1)                                     # (B, C)
    s = jax.nn.relu(s @ p["w1_2d"] + p["b1"])
    s = jax.nn.sigmoid(s @ p["w2_2d"] + p["b2"])
    return x * s[:, None, :]


def attentive_stats_pool_cl(x, p, eps=1e-12):
    """x: (B, T, C) -> pooled (B, 2C). lengths=None (uniform mask)."""
    B, T, C = x.shape
    mean = jnp.mean(x, axis=1)                                  # (B, C)
    std = jnp.sqrt(jnp.maximum(jnp.mean((x - mean[:, None, :]) ** 2, axis=1), eps))
    # ASP TDNN conv with its weight split into x / mean / std K-blocks: avoids
    # materializing the (B, 3C, T) concat.  Only the big x-part runs in Pallas.
    z = fused_matmul(x.reshape(B * T, C), p["w_x"])             # (B*T, A)
    ctx = mean @ p["w_mean"] + std @ p["w_std"] + p["b"]        # (B, A)
    a = z.reshape(B, T, -1) + ctx[:, None, :]
    a = jnp.tanh(jax.nn.relu(a) * p["scale"] + p["shift"])      # BN(ReLU) + tanh
    logits = fused_matmul(a.reshape(B * T, a.shape[-1]), p["conv_w2d"], p["conv_b"])
    # TODO(synk): lengths masking (masked_fill -inf) not implemented.
    attn = jax.nn.softmax(logits.reshape(B, T, C), axis=1)
    mean_w = jnp.sum(attn * x, axis=1)
    std_w = jnp.sqrt(jnp.maximum(
        jnp.sum(attn * (x - mean_w[:, None, :]) ** 2, axis=1), eps))
    return jnp.concatenate([mean_w, std_w], axis=-1)            # (B, 2C)


def ecapa_tdnn_forward(x_btf, prepped, cfg):
    """x_btf: (batch, time, feat) — already channels-last, no input transpose."""
    C, ks, dl = cfg["channels"], cfg["kernel_sizes"], cfg["dilations"]
    x = x_btf
    xl = []
    x = tdnn_block_cl(x, prepped["block0"], ks[0], dl[0])
    xl.append(x)
    for i in range(1, len(C) - 1):
        p = prepped["block%d" % i]
        residual = x
        if "shortcut" in p:
            residual = conv1d_cl(x, p["shortcut"]["w2d"], p["shortcut"]["b"], 1, 1)
        y = tdnn_block_cl(x, p["tdnn1"], 1, 1)
        y = res2net_block_cl(y, p["res2net"], cfg["res2net_scale"], ks[i], dl[i])
        y = tdnn_block_cl(y, p["tdnn2"], 1, 1)
        y = se_block_cl(y, p["se"])
        x = y + residual
        xl.append(x)
    x = jnp.concatenate(xl[1:], axis=-1)
    x = tdnn_block_cl(x, prepped["mfa"], ks[-1], dl[-1])
    pooled = attentive_stats_pool_cl(x, prepped["asp"])         # (B, 2C)
    # asp_bn folded into fc weights; M = batch rows -> plain JAX matmul.
    emb = pooled @ prepped["fc"]["w_eff"] + prepped["fc"]["b_eff"]
    return emb[:, None, :]                                      # (B, 1, lin)


# ---------------------------------------------------------------------------
# One-time parameter preparation (weight packing, casts, BN folding)
# ---------------------------------------------------------------------------

def _pack_conv_weight(w, dtype):
    """(Cout, Cin, k) -> (k*Cin, Cout), tap-major (matches the im2col concat)."""
    cout, cin, k = w.shape
    return jnp.transpose(w, (2, 1, 0)).reshape(k * cin, cout).astype(dtype)


def prepare_params(params, cfg, operand_dtype=jnp.bfloat16):
    """Pre-transpose / pre-cast weights and fold BatchNorm once (hoisted)."""
    f32 = jnp.float32
    C = cfg["channels"]

    def tdnn_prep(p):
        s, t = bn_affine(**p["bn"])
        return {"w2d": _pack_conv_weight(p["w"], operand_dtype),
                "b": p["b"].astype(f32), "scale": s, "shift": t}

    prepped = {"block0": tdnn_prep(params["block0"])}
    for i in range(1, len(C) - 1):
        p = params["block%d" % i]
        blk = {"tdnn1": tdnn_prep(p["tdnn1"]),
               "res2net": [tdnn_prep(q) for q in p["res2net"]],
               "tdnn2": tdnn_prep(p["tdnn2"]),
               "se": {"w1_2d": p["se"]["w1"][:, :, 0].T.astype(f32),
                      "b1": p["se"]["b1"].astype(f32),
                      "w2_2d": p["se"]["w2"][:, :, 0].T.astype(f32),
                      "b2": p["se"]["b2"].astype(f32)}}
        if "shortcut" in p:
            blk["shortcut"] = {"w2d": _pack_conv_weight(p["shortcut"]["w"],
                                                        operand_dtype),
                               "b": p["shortcut"]["b"].astype(f32)}
        prepped["block%d" % i] = blk
    prepped["mfa"] = tdnn_prep(params["mfa"])

    # ASP: split the 3C-wide TDNN weight into x / mean / std K-blocks.
    asp = params["asp"]
    Cl = C[-1]
    w_full = asp["tdnn"]["w"][:, :, 0].T                        # (3C, A)
    s, t = bn_affine(**asp["tdnn"]["bn"])
    prepped["asp"] = {
        "w_x": w_full[:Cl].astype(operand_dtype),
        "w_mean": w_full[Cl:2 * Cl].astype(f32),
        "w_std": w_full[2 * Cl:].astype(f32),
        "b": asp["tdnn"]["b"].astype(f32), "scale": s, "shift": t,
        "conv_w2d": asp["conv"]["w"][:, :, 0].T.astype(operand_dtype),
        "conv_b": asp["conv"]["b"].astype(f32),
    }

    # Fold the inference-mode asp_bn affine into the fc matmul.
    s, t = bn_affine(**params["asp_bn"])
    w_fc = params["fc"]["w"][:, :, 0].T                         # (2C, lin)
    prepped["fc"] = {"w_eff": (w_fc * s[:, None]).astype(f32),
                     "b_eff": (params["fc"]["b"] + t @ w_fc).astype(f32)}
    return prepped


# ---------------------------------------------------------------------------
# Parameter construction (deterministic)
# ---------------------------------------------------------------------------

def _conv_params(key, cout, cin, k, w_scale=0.1):
    kw, kb = jax.random.split(key)
    return {"w": w_scale * jax.random.normal(kw, (cout, cin, k), jnp.float32),
            "b": 0.05 * jax.random.normal(kb, (cout,), jnp.float32)}


def _bn_params(key, c):
    k1, k2, k3, k4 = jax.random.split(key, 4)
    return {"gamma": 1.0 + 0.1 * jax.random.normal(k1, (c,), jnp.float32),
            "beta": 0.1 * jax.random.normal(k2, (c,), jnp.float32),
            "mean": 0.1 * jax.random.normal(k3, (c,), jnp.float32),
            "var": jnp.abs(1.0 + 0.1 * jax.random.normal(k4, (c,), jnp.float32))}


def init_params(key, cfg):
    keys = iter(jax.random.split(key, 64))
    C, ks = cfg["channels"], cfg["kernel_sizes"]

    def tdnn_p(cin, cout, k):
        return {**_conv_params(next(keys), cout, cin, k),
                "bn": _bn_params(next(keys), cout)}

    params = {"block0": tdnn_p(cfg["input_size"], C[0], ks[0])}
    for i in range(1, len(C) - 1):
        inner = C[i] // cfg["res2net_scale"]
        se1 = _conv_params(next(keys), cfg["se_channels"], C[i], 1)
        se2 = _conv_params(next(keys), C[i], cfg["se_channels"], 1)
        blk = {
            "tdnn1": tdnn_p(C[i - 1], C[i], 1),
            "res2net": [tdnn_p(inner, inner, ks[i])
                        for _ in range(cfg["res2net_scale"] - 1)],
            "tdnn2": tdnn_p(C[i], C[i], 1),
            "se": {"w1": se1["w"], "b1": se1["b"], "w2": se2["w"], "b2": se2["b"]},
        }
        if C[i - 1] != C[i]:
            blk["shortcut"] = _conv_params(next(keys), C[i], C[i - 1], 1)
        params["block%d" % i] = blk
    params["mfa"] = tdnn_p(C[-2] * (len(C) - 2), C[-1], ks[-1])
    params["asp"] = {"tdnn": tdnn_p(3 * C[-1], cfg["attention_channels"], 1),
                     "conv": _conv_params(next(keys), C[-1],
                                          cfg["attention_channels"], 1)}
    params["asp_bn"] = _bn_params(next(keys), 2 * C[-1])
    params["fc"] = _conv_params(next(keys), cfg["lin_neurons"], 2 * C[-1], 1)
    return params


# ---------------------------------------------------------------------------
# Pure-JAX reference of the PyTorch forward (for correctness checking)
# ---------------------------------------------------------------------------

def _ref_conv1d_same(x, w, b, kernel, dilation):
    pad = dilation * (kernel - 1) // 2
    xp = jnp.pad(x, ((0, 0), (0, 0), (pad, pad)), mode="reflect") if pad else x
    y = jax.lax.conv_general_dilated(
        xp, w, window_strides=(1,), padding="VALID", rhs_dilation=(dilation,),
        dimension_numbers=("NCH", "OIH", "NCH"),
        precision=jax.lax.Precision.HIGHEST)
    return y + b[None, :, None]


def _ref_bn(x, bn, eps=1e-5):
    return ((x - bn["mean"][None, :, None])
            / jnp.sqrt(bn["var"][None, :, None] + eps)
            * bn["gamma"][None, :, None] + bn["beta"][None, :, None])


def _ref_tdnn(x, p, kernel, dilation):
    return _ref_bn(jax.nn.relu(_ref_conv1d_same(x, p["w"], p["b"], kernel, dilation)),
                   p["bn"])


def _ref_stats(x, m, eps=1e-12):
    mean = jnp.sum(m * x, axis=2)
    std = jnp.sqrt(jnp.maximum(jnp.sum(m * (x - mean[:, :, None]) ** 2, axis=2), eps))
    return mean, std


def _ref_forward(x_btf, params, cfg):
    C, ks, dl = cfg["channels"], cfg["kernel_sizes"], cfg["dilations"]
    x = jnp.transpose(x_btf, (0, 2, 1))
    xl = []
    x = _ref_tdnn(x, params["block0"], ks[0], dl[0])
    xl.append(x)
    for i in range(1, len(C) - 1):
        p = params["block%d" % i]
        residual = x
        if "shortcut" in p:
            residual = _ref_conv1d_same(x, p["shortcut"]["w"], p["shortcut"]["b"], 1, 1)
        y = _ref_tdnn(x, p["tdnn1"], 1, 1)
        chunks = jnp.split(y, cfg["res2net_scale"], axis=1)
        outs, y_i = [chunks[0]], None
        for j in range(1, cfg["res2net_scale"]):
            inp = chunks[j] if j == 1 else chunks[j] + y_i
            y_i = _ref_tdnn(inp, p["res2net"][j - 1], ks[i], dl[i])
            outs.append(y_i)
        y = jnp.concatenate(outs, axis=1)
        y = _ref_tdnn(y, p["tdnn2"], 1, 1)
        s = jnp.mean(y, axis=2, keepdims=True)
        s = jax.nn.relu(_ref_conv1d_same(s, p["se"]["w1"], p["se"]["b1"], 1, 1))
        s = jax.nn.sigmoid(_ref_conv1d_same(s, p["se"]["w2"], p["se"]["b2"], 1, 1))
        x = s * y + residual
        xl.append(x)
    x = jnp.concatenate(xl[1:], axis=1)
    x = _ref_tdnn(x, params["mfa"], ks[-1], dl[-1])
    B, Cc, T = x.shape
    m = jnp.ones((B, 1, T), jnp.float32) / T
    mean, std = _ref_stats(x, m)
    attn = jnp.concatenate([x,
                            jnp.broadcast_to(mean[:, :, None], (B, Cc, T)),
                            jnp.broadcast_to(std[:, :, None], (B, Cc, T))], axis=1)
    attn = jnp.tanh(_ref_tdnn(attn, params["asp"]["tdnn"], 1, 1))
    attn = _ref_conv1d_same(attn, params["asp"]["conv"]["w"],
                            params["asp"]["conv"]["b"], 1, 1)
    attn = jax.nn.softmax(attn, axis=2)
    mean, std = _ref_stats(x, attn)
    x = jnp.concatenate([mean, std], axis=1)[:, :, None]
    x = _ref_bn(x, params["asp_bn"])
    x = _ref_conv1d_same(x, params["fc"]["w"], params["fc"]["b"], 1, 1)
    return jnp.transpose(x, (0, 2, 1))                          # (B, 1, lin)


# ---------------------------------------------------------------------------
# Test
# ---------------------------------------------------------------------------

if __name__ == "__main__":
    cfg = dict(input_size=16,
               channels=[32, 32, 32, 32, 96],
               kernel_sizes=[5, 3, 3, 3, 1],
               dilations=[1, 2, 3, 4, 1],
               attention_channels=16,
               res2net_scale=4,
               se_channels=16,
               lin_neurons=32)

    key = jax.random.PRNGKey(0)
    kp, kx = jax.random.split(key)
    params = init_params(kp, cfg)

    B, T = 2, 16
    x = jax.random.normal(kx, (B, T, cfg["input_size"]), jnp.float32)

    ref = jax.block_until_ready(_ref_forward(x, params, cfg))

    fwd = jax.jit(lambda xx, pp: ecapa_tdnn_forward(xx, pp, cfg))

    # 1) f32 MXU operands: strict check against the pure-JAX reference.
    prep_f32 = prepare_params(params, cfg, operand_dtype=jnp.float32)
    out_f32 = jax.block_until_ready(fwd(x, prep_f32))
    assert out_f32.shape == (B, 1, cfg["lin_neurons"]), out_f32.shape
    err_f32 = float(jnp.max(jnp.abs(out_f32 - ref)))
    assert jnp.allclose(out_f32, ref, atol=2e-3, rtol=2e-3), \
        f"f32 max abs err {err_f32}"

    # 2) bf16 MXU operands, f32 accumulate (production/perf config): loose check.
    prep_bf16 = prepare_params(params, cfg, operand_dtype=jnp.bfloat16)
    out_bf16 = jax.block_until_ready(fwd(x, prep_bf16))
    assert out_bf16.shape == (B, 1, cfg["lin_neurons"]), out_bf16.shape
    assert bool(jnp.all(jnp.isfinite(out_bf16)))
    err_bf16 = float(jnp.max(jnp.abs(out_bf16 - ref)))
    assert err_bf16 < 2.5e-1, f"bf16 max abs err {err_bf16}"

    print("KERNEL_OK")
</pallas_src>

<mosaic_0001>
module attributes {stable_mosaic.version = 11 : i64} {
  func.func @_mm_kernel_resident(%arg0: i32, %arg1: i32, %arg2: memref<32x128xf32, #tpu.memory_space<vmem>>, %arg3: memref<128x128xf32, #tpu.memory_space<vmem>>, %arg4: memref<8x128xf32, #tpu.memory_space<vmem>>, %arg5: memref<32x128xf32, #tpu.memory_space<vmem>>) attributes {dimension_semantics = [#tpu.dimension_semantics<parallel>, #tpu.dimension_semantics<parallel>], iteration_bounds = array<i64: 1, 1>, scalar_prefetch = 0 : i64, scratch_operands = 0 : i64, tpu.core_type = #tpu.core_type<tc>, window_params = [{transform_indices = @transform_0, window_bounds = array<i64: 32, 128>}, {transform_indices = @transform_1, window_bounds = array<i64: 128, 128>}, {transform_indices = @transform_2, window_bounds = array<i64: 8, 128>}, {transform_indices = @transform_3, window_bounds = array<i64: 32, 128>}]} {
    %c0 = arith.constant 0 : index
    %c0_0 = arith.constant 0 : index
    %0 = vector.load %arg2[%c0, %c0_0] : memref<32x128xf32, #tpu.memory_space<vmem>>, vector<32x128xf32>
    %c0_1 = arith.constant 0 : index
    %c0_2 = arith.constant 0 : index
    %1 = vector.load %arg3[%c0_1, %c0_2] : memref<128x128xf32, #tpu.memory_space<vmem>>, vector<128x128xf32>
    %cst = arith.constant dense<0.000000e+00> : vector<32x128xf32>
    %2 = tpu.matmul %0, %1, %cst {dimension_numbers = #tpu.dot_dimension_numbers<[1], [0], [0], [1], [0, 0, 1, 1], [], []>} : vector<32x128xf32>, vector<128x128xf32>, vector<32x128xf32> -> vector<32x128xf32>
    %c0_3 = arith.constant 0 : index
    %c0_4 = arith.constant 0 : index
    %3 = vector.load %arg4[%c0_3, %c0_4] : memref<8x128xf32, #tpu.memory_space<vmem>>, vector<1x128xf32>
    %4 = vector.broadcast %3 : vector<1x128xf32> to vector<32x128xf32>
    %5 = arith.addf %2, %4 : vector<32x128xf32>
    %cst_5 = arith.constant 0.000000e+00 : f32
    %6 = vector.broadcast %cst_5 : f32 to vector<32x128xf32>
    %7 = arith.maximumf %5, %6 : vector<32x128xf32>
    %c1 = arith.constant 1 : index
    %c0_6 = arith.constant 0 : index
    %8 = vector.load %arg4[%c1, %c0_6] : memref<8x128xf32, #tpu.memory_space<vmem>>, vector<1x128xf32>
    %9 = vector.broadcast %8 : vector<1x128xf32> to vector<32x128xf32>
    %10 = arith.mulf %7, %9 : vector<32x128xf32>
    %c2 = arith.constant 2 : index
    %c0_7 = arith.constant 0 : index
    %11 = vector.load %arg4[%c2, %c0_7] : memref<8x128xf32, #tpu.memory_space<vmem>>, vector<1x128xf32>
    %12 = vector.broadcast %11 : vector<1x128xf32> to vector<32x128xf32>
    %13 = arith.addf %10, %12 : vector<32x128xf32>
    %c0_8 = arith.constant 0 : index
    %c0_9 = arith.constant 0 : index
    %14 = vector.load %arg5[%c0_8, %c0_9] : memref<32x128xf32, #tpu.memory_space<vmem>>, vector<32x128xf32>
    tpu.vector_store %arg5[%c0_8, %c0_9], %13 {strides = array<i32>} : memref<32x128xf32, #tpu.memory_space<vmem>>, vector<32x128xf32>,
    return
  }
  func.func @transform_0(%arg0: i32, %arg1: i32) -> (i32, i32) {
    %c0_i32 = arith.constant 0 : i32
    %c0_i32_0 = arith.constant 0 : i32
    return %arg0, %c0_i32 : i32, i32
  }
  func.func @transform_1(%arg0: i32, %arg1: i32) -> (i32, i32) {
    %c0_i32 = arith.constant 0 : i32
    %c0_i32_0 = arith.constant 0 : i32
    return %c0_i32, %arg1 : i32, i32
  }
  func.func @transform_2(%arg0: i32, %arg1: i32) -> (i32, i32) {
    %c0_i32 = arith.constant 0 : i32
    %c0_i32_0 = arith.constant 0 : i32
    return %c0_i32, %arg1 : i32, i32
  }
  func.func @transform_3(%arg0: i32, %arg1: i32) -> (i32, i32) {
    %c0_i32 = arith.constant 0 : i32
    return %arg0, %arg1 : i32, i32
  }
}

module attributes {stable_mosaic.version = 11 : i64} {
  func.func @_mm_kernel_resident(%arg0: i32, %arg1: i32, %arg2: memref<32x128xf32, #tpu.memory_space<vmem>>, %arg3: memref<128x128xf32, #tpu.memory_space<vmem>>, %arg4: memref<8x128xf32, #tpu.memory_space<vmem>>, %arg5: memref<32x128xf32, #tpu.memory_space<vmem>>) attributes {dimension_semantics = [#tpu.dimension_semantics<parallel>, #tpu.dimension_semantics<parallel>], iteration_bounds = array<i64: 1, 1>, scalar_prefetch = 0 : i64, scratch_operands = 0 : i64, tpu.core_type = #tpu.core_type<tc>, window_params = [{transform_indices = @transform_0, window_bounds = array<i64: 32, 128>}, {transform_indices = @transform_1, window_bounds = array<i64: 128, 128>}, {transform_indices = @transform_2, window_bounds = array<i64: 8, 128>}, {transform_indices = @transform_3, window_bounds = array<i64: 32, 128>}]} {
    %c0 = arith.constant 0 : index
    %c0_0 = arith.constant 0 : index
    %0 = vector.load %arg2[%c0, %c0_0] : memref<32x128xf32, #tpu.memory_space<vmem>>, vector<32x128xf32>
    %c0_1 = arith.constant 0 : index
    %c0_2 = arith.constant 0 : index
    %1 = vector.load %arg3[%c0_1, %c0_2] : memref<128x128xf32, #tpu.memory_space<vmem>>, vector<128x128xf32>
    %cst = arith.constant dense<0.000000e+00> : vector<32x128xf32>
    %2 = tpu.matmul %0, %1, %cst {dimension_numbers = #tpu.dot_dimension_numbers<[1], [0], [0], [1], [0, 0, 1, 1], [], []>} : vector<32x128xf32>, vector<128x128xf32>, vector<32x128xf32> -> vector<32x128xf32>
    %c0_3 = arith.constant 0 : index
    %c0_4 = arith.constant 0 : index
    %3 = vector.load %arg4[%c0_3, %c0_4] : memref<8x128xf32, #tpu.memory_space<vmem>>, vector<1x128xf32>
    %4 = vector.broadcast %3 : vector<1x128xf32> to vector<32x128xf32>
    %5 = arith.addf %2, %4 : vector<32x128xf32>
    %c1 = arith.constant 1 : index
    %c0_5 = arith.constant 0 : index
    %6 = vector.load %arg4[%c1, %c0_5] : memref<8x128xf32, #tpu.memory_space<vmem>>, vector<1x128xf32>
    %7 = vector.broadcast %6 : vector<1x128xf32> to vector<32x128xf32>
    %8 = arith.mulf %5, %7 : vector<32x128xf32>
    %c2 = arith.constant 2 : index
    %c0_6 = arith.constant 0 : index
    %9 = vector.load %arg4[%c2, %c0_6] : memref<8x128xf32, #tpu.memory_space<vmem>>, vector<1x128xf32>
    %10 = vector.broadcast %9 : vector<1x128xf32> to vector<32x128xf32>
    %11 = arith.addf %8, %10 : vector<32x128xf32>
    %c0_7 = arith.constant 0 : index
    %c0_8 = arith.constant 0 : index
    %12 = vector.load %arg5[%c0_7, %c0_8] : memref<32x128xf32, #tpu.memory_space<vmem>>, vector<32x128xf32>
    tpu.vector_store %arg5[%c0_7, %c0_8], %11 {strides = array<i32>} : memref<32x128xf32, #tpu.memory_space<vmem>>, vector<32x128xf32>,
    return
  }
  func.func @transform_0(%arg0: i32, %arg1: i32) -> (i32, i32) {
    %c0_i32 = arith.constant 0 : i32
    %c0_i32_0 = arith.constant 0 : i32
    return %arg0, %c0_i32 : i32, i32
  }
  func.func @transform_1(%arg0: i32, %arg1: i32) -> (i32, i32) {
    %c0_i32 = arith.constant 0 : i32
    %c0_i32_0 = arith.constant 0 : i32
    return %c0_i32, %arg1 : i32, i32
  }
  func.func @transform_2(%arg0: i32, %arg1: i32) -> (i32, i32) {
    %c0_i32 = arith.constant 0 : i32
    %c0_i32_0 = arith.constant 0 : i32
    return %c0_i32, %arg1 : i32, i32
  }
  func.func @transform_3(%arg0: i32, %arg1: i32) -> (i32, i32) {
    %c0_i32 = arith.constant 0 : i32
    return %arg0, %arg1 : i32, i32
  }
}

</mosaic_0001>

<bundles_post_ra>
// kernel: _lambda_.19
= control target key start
LH: loop header
LB: loop body
LE: loop exit
PB: predicated region body
PF: predicated region fallthrough
CT: control target
= control target key end

     0   :  { %s364_s1 = inlined_call_operand.vmem [shape: f32[128,128], index: 1, kind: input, shape index: {}]   ;;  %s365_s0 = inlined_call_operand.vmem [shape: f32[32,128], index: 0, kind: input, shape index: {}]   ;;  %s366_s2 = inlined_call_operand.vmem [shape: f32[8,128], index: 2, kind: input, shape index: {}]   ;;  %s367_s3 = inlined_call_operand.vmem [shape: f32[32,128], index: 3, kind: output, shape index: {}]  }
   0x1   :  { %v18_v0 = vld [vmem:[%s364_s1] sm:$0xff]  ;;  %v19_v1 = vld [vmem:[%s364_s1 + $0x8] sm:$0xff]  ;;  %v20_v2 = vld [vmem:[%s364_s1 + $0x10] sm:$0xff] }
   0x2   :  { %v215_v3 = vpack.c.bf16 %v19_v1, %v18_v0  ;;  %v21_v4 = vld [vmem:[%s364_s1 + $0x18] sm:$0xff]  ;;  %v22_v6 = vld [vmem:[%s364_s1 + $0x20] sm:$0xff]  ;;  %v23_v7 = vld [vmem:[%s364_s1 + $0x28] sm:$0xff] }
   0x3   :  { %v219_v5 = vpack.c.bf16 %v21_v4, %v20_v2  ;;  %v223_v8 = vpack.c.bf16 %v23_v7, %v22_v6  ;;  %v14_v9 = vld [vmem:[%s365_s0] sm:$0xff]  ;;  %v16_v10 = vld [vmem:[%s365_s0 + $0x10] sm:$0xff]  ;;  %v25_v12 = vld [vmem:[%s364_s1 + $0x38] sm:$0xff] }
   0x4   :  { %216 = vmatprep.subr.bf16.mxu0 %v215_v3  ;;  %247 = vmatprep.subr.bf16.mxu1 %v215_v3  ;;  %v24_v11 = vld [vmem:[%s364_s1 + $0x30] sm:$0xff]  ;;  %v26_v14 = vld [vmem:[%s364_s1 + $0x40] sm:$0xff]  ;;  %v27_v15 = vld [vmem:[%s364_s1 + $0x48] sm:$0xff] }
   0x5   :  { %218 = vmatpush3.bf16.msra.mxu0 %v215_v3  ;;  %255 = vmatpush3.bf16.msra.mxu1 %v215_v3  ;;  %v227_v13 = vpack.c.bf16 %v25_v12, %v24_v11  ;;  %v231_v16 = vpack.c.bf16 %v27_v15, %v26_v14  ;;  %v28_v17 = vld [vmem:[%s364_s1 + $0x50] sm:$0xff]  ;;  %v29_v18 = vld [vmem:[%s364_s1 + $0x58] sm:$0xff]  ;;  %v30_v20 = vld [vmem:[%s364_s1 + $0x60] sm:$0xff] }
   0x6   :  { %220 = vmatprep.subr.bf16.mxu0 %v219_v5  ;;  %248 = vmatprep.subr.bf16.mxu1 %v219_v5  ;;  %v235_v19 = vpack.c.bf16 %v29_v18, %v28_v17  ;;  %v31_v21 = vld [vmem:[%s364_s1 + $0x68] sm:$0xff]  ;;  %v32_v23 = vld [vmem:[%s364_s1 + $0x70] sm:$0xff]  ;;  %v33_v24 = vld [vmem:[%s364_s1 + $0x78] sm:$0xff] }
   0x7   :  { %209 = vmatprep.mubr.f32.mxu0 %v14_v9  ;;  %212 = vmatprep.mubr.f32.mxu1 %v16_v10  ;;  %v239_v22 = vpack.c.bf16 %v31_v21, %v30_v20  ;;  %v243_v25 = vpack.c.bf16 %v33_v24, %v32_v23  ;;  %v15_v26 = vld [vmem:[%s365_s0 + $0x8] sm:$0xff]  ;;  %v17_v27 = vld [vmem:[%s365_s0 + $0x18] sm:$0xff]  ;;  %v154_v28 = vld [vmem:[%s366_s2] ss:$0 sm:$0xff] }
   0x8   :  { %v155_v35 = vld [vmem:[%s366_s2 + $0x1] ss:$0 sm:$0xff]  ;;  %v156_v40 = vld [vmem:[%s366_s2 + $0x2] ss:$0 sm:$0xff] }
   0x9   :  { %222 = vmatpush3.bf16.msra.mxu0 %v219_v5  ;;  %256 = vmatpush3.bf16.msra.mxu1 %v219_v5 }
   0xa   :  { %224 = vmatprep.subr.bf16.mxu0 %v223_v8  ;;  %249 = vmatprep.subr.bf16.mxu1 %v223_v8 }
   0xd   :  { %226 = vmatpush3.bf16.msra.mxu0 %v223_v8  ;;  %257 = vmatpush3.bf16.msra.mxu1 %v223_v8 }
   0xe   :  { %228 = vmatprep.subr.bf16.mxu0 %v227_v13  ;;  %250 = vmatprep.subr.bf16.mxu1 %v227_v13 }
  0x11   :  { %230 = vmatpush3.bf16.msra.mxu0 %v227_v13  ;;  %258 = vmatpush3.bf16.msra.mxu1 %v227_v13 }
  0x12   :  { %232 = vmatprep.subr.bf16.mxu0 %v231_v16  ;;  %251 = vmatprep.subr.bf16.mxu1 %v231_v16 }
  0x15   :  { %234 = vmatpush3.bf16.msra.mxu0 %v231_v16  ;;  %259 = vmatpush3.bf16.msra.mxu1 %v231_v16 }
  0x16   :  { %236 = vmatprep.subr.bf16.mxu0 %v235_v19  ;;  %252 = vmatprep.subr.bf16.mxu1 %v235_v19 }
  0x19   :  { %238 = vmatpush3.bf16.msra.mxu0 %v235_v19  ;;  %260 = vmatpush3.bf16.msra.mxu1 %v235_v19 }
  0x1a   :  { %240 = vmatprep.subr.bf16.mxu0 %v239_v22  ;;  %253 = vmatprep.subr.bf16.mxu1 %v239_v22 }
  0x1d   :  { %242 = vmatpush3.bf16.msra.mxu0 %v239_v22  ;;  %261 = vmatpush3.bf16.msra.mxu1 %v239_v22 }
  0x1e   :  { %244 = vmatprep.subr.bf16.mxu0 %v243_v25  ;;  %254 = vmatprep.subr.bf16.mxu1 %v243_v25 }
  0x21   :  { %246 = vmatpush3.bf16.msra.mxu0 %v243_v25  ;;  %262 = vmatpush3.bf16.msra.mxu1 %v243_v25 }
  0x24   :  { %210 = vmatmul.mubr.f32.vlgmr.msra.gmra.mrb[0].mxu0 %v15_v26  ;;  %213 = vmatmul.mubr.f32.vlgmr.msra.gmra.mrb[0].mxu1 %v17_v27 }
  0xf7   :  { %v211_v29 = vpop.f32.mrb[0].mxu0  ;;  %v214_v30 = vpop.f32.mrb[0].mxu1 }
  0xf8   :  { %v111_v31 = vadd.f32 %v211_v29, %v154_v28  ;;  %v121_v32 = vadd.f32 %v214_v30, %v154_v28  ;;  %v105_v33 = vpop.f32.mrb[1].mxu0  ;;  %v115_v34 = vpop.f32.mrb[1].mxu1 }
  0xf9   :  { %v106_v36 = vadd.f32 %v154_v28, %v105_v33  ;;  %v116_v37 = vadd.f32 %v154_v28, %v115_v34 }
  0xfa   :  { %v125_v38 = vmax.f32 %v111_v31, 0.0  ;;  %v127_v39 = vmax.f32 %v121_v32, 0.0 }
  0xfb   :  { %v124_v41 = vmax.f32 %v106_v36, 0.0  ;;  %v126_v42 = vmax.f32 %v116_v37, 0.0 }
  0xfc   :  { %v134_v43 = vmul.f32 %v155_v35, %v125_v38  ;;  %v136_v44 = vmul.f32 %v155_v35, %v127_v39 }
  0xfd   :  { %v133_v45 = vmul.f32 %v155_v35, %v124_v41  ;;  %v135_v46 = vmul.f32 %v155_v35, %v126_v42 }
  0xfe   :  { %v143_v47 = vadd.f32 %v156_v40, %v134_v43  ;;  %v145_v48 = vadd.f32 %v156_v40, %v136_v44 }
  0xff   :  { %v142_v49 = vadd.f32 %v156_v40, %v133_v45  ;;  %v144_v50 = vadd.f32 %v156_v40, %v135_v46 }
 0x100   :  { %147 = vst [vmem:[%s367_s3 + $0x8] sm:$0xff] %v143_v47  ;;  %149 = vst [vmem:[%s367_s3 + $0x18] sm:$0xff] %v145_v48 }
 0x101   :  { %146 = vst [vmem:[%s367_s3] sm:$0xff] %v142_v49  ;;  %148 = vst [vmem:[%s367_s3 + $0x10] sm:$0xff] %v144_v50 }

// kernel: _lambda_.36
= control target key start
LH: loop header
LB: loop body
LE: loop exit
PB: predicated region body
PF: predicated region fallthrough
CT: control target
= control target key end

     0   :  { %s360_s1 = inlined_call_operand.vmem [shape: f32[128,128], index: 1, kind: input, shape index: {}]   ;;  %s361_s0 = inlined_call_operand.vmem [shape: f32[32,128], index: 0, kind: input, shape index: {}]   ;;  %s362_s2 = inlined_call_operand.vmem [shape: f32[8,128], index: 2, kind: input, shape index: {}]   ;;  %s363_s3 = inlined_call_operand.vmem [shape: f32[32,128], index: 3, kind: output, shape index: {}]  }
   0x1   :  { %v18_v0 = vld [vmem:[%s360_s1] sm:$0xff]  ;;  %v19_v1 = vld [vmem:[%s360_s1 + $0x8] sm:$0xff]  ;;  %v20_v2 = vld [vmem:[%s360_s1 + $0x10] sm:$0xff] }
   0x2   :  { %v211_v3 = vpack.c.bf16 %v19_v1, %v18_v0  ;;  %v21_v4 = vld [vmem:[%s360_s1 + $0x18] sm:$0xff]  ;;  %v22_v6 = vld [vmem:[%s360_s1 + $0x20] sm:$0xff]  ;;  %v23_v7 = vld [vmem:[%s360_s1 + $0x28] sm:$0xff] }
   0x3   :  { %v215_v5 = vpack.c.bf16 %v21_v4, %v20_v2  ;;  %v219_v8 = vpack.c.bf16 %v23_v7, %v22_v6  ;;  %v14_v9 = vld [vmem:[%s361_s0] sm:$0xff]  ;;  %v16_v10 = vld [vmem:[%s361_s0 + $0x10] sm:$0xff]  ;;  %v25_v12 = vld [vmem:[%s360_s1 + $0x38] sm:$0xff] }
   0x4   :  { %212 = vmatprep.subr.bf16.mxu0 %v211_v3  ;;  %243 = vmatprep.subr.bf16.mxu1 %v211_v3  ;;  %v24_v11 = vld [vmem:[%s360_s1 + $0x30] sm:$0xff]  ;;  %v26_v14 = vld [vmem:[%s360_s1 + $0x40] sm:$0xff]  ;;  %v27_v15 = vld [vmem:[%s360_s1 + $0x48] sm:$0xff] }
   0x5   :  { %214 = vmatpush3.bf16.msra.mxu0 %v211_v3  ;;  %251 = vmatpush3.bf16.msra.mxu1 %v211_v3  ;;  %v223_v13 = vpack.c.bf16 %v25_v12, %v24_v11  ;;  %v227_v16 = vpack.c.bf16 %v27_v15, %v26_v14  ;;  %v28_v17 = vld [vmem:[%s360_s1 + $0x50] sm:$0xff]  ;;  %v29_v18 = vld [vmem:[%s360_s1 + $0x58] sm:$0xff]  ;;  %v30_v20 = vld [vmem:[%s360_s1 + $0x60] sm:$0xff] }
   0x6   :  { %216 = vmatprep.subr.bf16.mxu0 %v215_v5  ;;  %244 = vmatprep.subr.bf16.mxu1 %v215_v5  ;;  %v231_v19 = vpack.c.bf16 %v29_v18, %v28_v17  ;;  %v31_v21 = vld [vmem:[%s360_s1 + $0x68] sm:$0xff]  ;;  %v32_v23 = vld [vmem:[%s360_s1 + $0x70] sm:$0xff]  ;;  %v33_v24 = vld [vmem:[%s360_s1 + $0x78] sm:$0xff] }
   0x7   :  { %205 = vmatprep.mubr.f32.mxu0 %v14_v9  ;;  %208 = vmatprep.mubr.f32.mxu1 %v16_v10  ;;  %v235_v22 = vpack.c.bf16 %v31_v21, %v30_v20  ;;  %v239_v25 = vpack.c.bf16 %v33_v24, %v32_v23  ;;  %v15_v26 = vld [vmem:[%s361_s0 + $0x8] sm:$0xff]  ;;  %v17_v27 = vld [vmem:[%s361_s0 + $0x18] sm:$0xff]  ;;  %v150_v28 = vld [vmem:[%s362_s2] ss:$0 sm:$0xff] }
   0x8   :  { %v151_v30 = vld [vmem:[%s362_s2 + $0x1] ss:$0 sm:$0xff]  ;;  %v152_v36 = vld [vmem:[%s362_s2 + $0x2] ss:$0 sm:$0xff] }
   0x9   :  { %218 = vmatpush3.bf16.msra.mxu0 %v215_v5  ;;  %252 = vmatpush3.bf16.msra.mxu1 %v215_v5 }
   0xa   :  { %220 = vmatprep.subr.bf16.mxu0 %v219_v8  ;;  %245 = vmatprep.subr.bf16.mxu1 %v219_v8 }
   0xd   :  { %222 = vmatpush3.bf16.msra.mxu0 %v219_v8  ;;  %253 = vmatpush3.bf16.msra.mxu1 %v219_v8 }
   0xe   :  { %224 = vmatprep.subr.bf16.mxu0 %v223_v13  ;;  %246 = vmatprep.subr.bf16.mxu1 %v223_v13 }
  0x11   :  { %226 = vmatpush3.bf16.msra.mxu0 %v223_v13  ;;  %254 = vmatpush3.bf16.msra.mxu1 %v223_v13 }
  0x12   :  { %228 = vmatprep.subr.bf16.mxu0 %v227_v16  ;;  %247 = vmatprep.subr.bf16.mxu1 %v227_v16 }
  0x15   :  { %230 = vmatpush3.bf16.msra.mxu0 %v227_v16  ;;  %255 = vmatpush3.bf16.msra.mxu1 %v227_v16 }
  0x16   :  { %232 = vmatprep.subr.bf16.mxu0 %v231_v19  ;;  %248 = vmatprep.subr.bf16.mxu1 %v231_v19 }
  0x19   :  { %234 = vmatpush3.bf16.msra.mxu0 %v231_v19  ;;  %256 = vmatpush3.bf16.msra.mxu1 %v231_v19 }
  0x1a   :  { %236 = vmatprep.subr.bf16.mxu0 %v235_v22  ;;  %249 = vmatprep.subr.bf16.mxu1 %v235_v22 }
  0x1d   :  { %238 = vmatpush3.bf16.msra.mxu0 %v235_v22  ;;  %257 = vmatpush3.bf16.msra.mxu1 %v235_v22 }
  0x1e   :  { %240 = vmatprep.subr.bf16.mxu0 %v239_v25  ;;  %250 = vmatprep.subr.bf16.mxu1 %v239_v25 }
  0x21   :  { %242 = vmatpush3.bf16.msra.mxu0 %v239_v25  ;;  %258 = vmatpush3.bf16.msra.mxu1 %v239_v25 }
  0x24   :  { %206 = vmatmul.mubr.f32.vlgmr.msra.gmra.mrb[0].mxu0 %v15_v26  ;;  %209 = vmatmul.mubr.f32.vlgmr.msra.gmra.mrb[0].mxu1 %v17_v27 }
  0xf7   :  { %v207_v29 = vpop.f32.mrb[0].mxu0  ;;  %v210_v31 = vpop.f32.mrb[0].mxu1 }
  0xf8   :  { %v111_v32 = vadd.f32 %v207_v29, %v150_v28  ;;  %v121_v33 = vadd.f32 %v210_v31, %v150_v28  ;;  %v105_v34 = vpop.f32.mrb[1].mxu0  ;;  %v115_v35 = vpop.f32.mrb[1].mxu1 }
  0xf9   :  { %v106_v37 = vadd.f32 %v150_v28, %v105_v34  ;;  %v116_v38 = vadd.f32 %v150_v28, %v115_v35 }
  0xfa   :  { %v130_v39 = vmul.f32 %v151_v30, %v111_v32  ;;  %v132_v40 = vmul.f32 %v151_v30, %v121_v33 }
  0xfb   :  { %v129_v41 = vmul.f32 %v151_v30, %v106_v37  ;;  %v131_v42 = vmul.f32 %v151_v30, %v116_v38 }
  0xfc   :  { %v139_v43 = vadd.f32 %v152_v36, %v130_v39  ;;  %v141_v44 = vadd.f32 %v152_v36, %v132_v40 }
  0xfd   :  { %v138_v45 = vadd.f32 %v152_v36, %v129_v41  ;;  %v140_v46 = vadd.f32 %v152_v36, %v131_v42 }
  0xfe   :  { %143 = vst [vmem:[%s363_s3 + $0x8] sm:$0xff] %v139_v43  ;;  %145 = vst [vmem:[%s363_s3 + $0x18] sm:$0xff] %v141_v44 }
  0xff   :  { %142 = vst [vmem:[%s363_s3] sm:$0xff] %v138_v45  ;;  %144 = vst [vmem:[%s363_s3 + $0x10] sm:$0xff] %v140_v46 }

</bundles_post_ra>
